<compile_context>
chip_gen: v5e
topology: v5e:2x2
jax: 0.10.0
libtpu: 0.0.40
codegen_flags: <defaults>
</compile_context>

<pallas_src>
import functools

import numpy as np
import jax
import jax.numpy as jnp
from jax.experimental import pallas as pl
from jax.experimental.pallas import tpu as pltpu

BN_EPS = 1e-5
VMEM_LIMIT = 32 * 1024 * 1024
TILE_M = 512


# ---------------------------------------------------------------------------
# Small helpers
# ---------------------------------------------------------------------------
def _round_up(x, m):
    return (x + m - 1) // m * m


def _pad_rows(a, m_padded):
    m = a.shape[0]
    if m == m_padded:
        return a
    return jnp.pad(a, ((0, m_padded - m), (0, 0)))


def _pick_row_tile(ho, wp):
    # Largest divisor of the output height whose (rows * padded-width) block is a
    # multiple of 8 sublanes and small enough to keep the f32 accumulator modest.
    for d in (64, 32, 16, 8, 4, 2, 1):
        if ho % d == 0 and (d * wp) % 8 == 0 and d * wp <= 2048:
            return d
    return ho  # full extent: block dim == array dim, always legal


# ---------------------------------------------------------------------------
# Pallas kernels
# ---------------------------------------------------------------------------
def _mm_bn_kernel(x_ref, w_ref, s_ref, b_ref, o_ref, *, relu):
    acc = jnp.dot(x_ref[...], w_ref[...], preferred_element_type=jnp.float32)
    y = acc * s_ref[...] + b_ref[...]
    if relu:
        y = jnp.maximum(y, 0.0)
    o_ref[...] = y.astype(o_ref.dtype)


def _mm_bn_add_kernel(x_ref, w_ref, s_ref, b_ref, r_ref, o_ref):
    # 1x1 conv + BN + (identity residual) + ReLU
    acc = jnp.dot(x_ref[...], w_ref[...], preferred_element_type=jnp.float32)
    y = acc * s_ref[...] + b_ref[...] + r_ref[...].astype(jnp.float32)
    o_ref[...] = jnp.maximum(y, 0.0).astype(o_ref.dtype)


def _mm_bn_dual_kernel(x_ref, w_ref, s_ref, b_ref,
                       xs_ref, ws_ref, ss_ref, bs_ref, o_ref):
    # conv3 + bn3  fused with  shortcut 1x1 conv + bn  + add + ReLU
    main = jnp.dot(x_ref[...], w_ref[...], preferred_element_type=jnp.float32)
    main = main * s_ref[...] + b_ref[...]
    sc = jnp.dot(xs_ref[...], ws_ref[...], preferred_element_type=jnp.float32)
    sc = sc * ss_ref[...] + bs_ref[...]
    o_ref[...] = jnp.maximum(main + sc, 0.0).astype(o_ref.dtype)


def _conv3x3_bn_relu_kernel(xp_ref, w_ref, s_ref, b_ref, o_ref, *, th, wp):
    # xp_ref: (Hp*Wp, Cin) padded image of one batch element (VMEM resident).
    # For output rows [t*th, t*th+th) x all padded columns, accumulate 9 shifted
    # dense matmuls.  The last 2 columns of every row are garbage (cross the row
    # boundary of the padded image) and are discarded by the caller.
    base = pl.program_id(1) * (th * wp)
    cout = o_ref.shape[-1]
    acc = jnp.zeros((th * wp, cout), jnp.float32)
    for kh in range(3):
        for kw in range(3):
            lhs = xp_ref[pl.ds(base + kh * wp + kw, th * wp), :]
            acc = acc + jnp.dot(lhs, w_ref[kh * 3 + kw],
                                preferred_element_type=jnp.float32)
    y = jnp.maximum(acc * s_ref[...] + b_ref[...], 0.0)
    o_ref[...] = y.astype(o_ref.dtype)


# ---------------------------------------------------------------------------
# pallas_call wrappers
# ---------------------------------------------------------------------------
def matmul_bn(x, w, scale, bias, *, relu, residual=None,
              out_dtype=jnp.float32, tile_m=TILE_M):
    """x: (M, K), w: (K, Cout), scale/bias: (1, Cout) -> (M, Cout)."""
    m, k = x.shape
    cout = w.shape[1]
    tm = min(tile_m, _round_up(m, 8))
    mp = _round_up(m, tm)
    x = _pad_rows(x, mp)

    args = [x, w, scale, bias]
    in_specs = [
        pl.BlockSpec((tm, k), lambda i: (i, 0)),
        pl.BlockSpec((k, cout), lambda i: (0, 0)),   # weight resident across M
        pl.BlockSpec((1, cout), lambda i: (0, 0)),
        pl.BlockSpec((1, cout), lambda i: (0, 0)),
    ]
    if residual is None:
        kernel = functools.partial(_mm_bn_kernel, relu=relu)
    else:
        kernel = _mm_bn_add_kernel
        args.append(_pad_rows(residual, mp))
        in_specs.append(pl.BlockSpec((tm, cout), lambda i: (i, 0)))

    out = pl.pallas_call(
        kernel,
        out_shape=jax.ShapeDtypeStruct((mp, cout), out_dtype),
        grid=(mp // tm,),
        in_specs=in_specs,
        out_specs=pl.BlockSpec((tm, cout), lambda i: (i, 0)),
        compiler_params=pltpu.CompilerParams(
            dimension_semantics=("parallel",),
            vmem_limit_bytes=VMEM_LIMIT),
    )(*args)
    return out[:m] if mp != m else out


def matmul_bn_dual(x, w, scale, bias, xs, ws, ssc, bsc, *,
                   out_dtype=jnp.float32, tile_m=TILE_M):
    """Fused conv3+bn3 and shortcut conv+bn, add, ReLU.  x:(M,K), xs:(M,Ks)."""
    m, k = x.shape
    cout = w.shape[1]
    ks = ws.shape[0]
    tm = min(tile_m, _round_up(m, 8))
    mp = _round_up(m, tm)
    x = _pad_rows(x, mp)
    xs = _pad_rows(xs, mp)

    out = pl.pallas_call(
        _mm_bn_dual_kernel,
        out_shape=jax.ShapeDtypeStruct((mp, cout), out_dtype),
        grid=(mp // tm,),
        in_specs=[
            pl.BlockSpec((tm, k), lambda i: (i, 0)),
            pl.BlockSpec((k, cout), lambda i: (0, 0)),
            pl.BlockSpec((1, cout), lambda i: (0, 0)),
            pl.BlockSpec((1, cout), lambda i: (0, 0)),
            pl.BlockSpec((tm, ks), lambda i: (i, 0)),
            pl.BlockSpec((ks, cout), lambda i: (0, 0)),
            pl.BlockSpec((1, cout), lambda i: (0, 0)),
            pl.BlockSpec((1, cout), lambda i: (0, 0)),
        ],
        out_specs=pl.BlockSpec((tm, cout), lambda i: (i, 0)),
        compiler_params=pltpu.CompilerParams(
            dimension_semantics=("parallel",),
            vmem_limit_bytes=VMEM_LIMIT),
    )(x, w, scale, bias, xs, ws, ssc, bsc)
    return out[:m] if mp != m else out


def conv3x3_bn_relu(x_nhwc, w_taps, scale, bias, *, out_dtype):
    """Fused 3x3 conv (stride 1, pad 1) + BN + ReLU with in-kernel tap accumulation.

    x_nhwc: (N, H, W, Cin) bf16, w_taps: (9, Cin, Cout) bf16 (block-diagonal dense).
    Returns flat (N*H*W, Cout).
    """
    n, h, w, c = x_nhwc.shape
    ho, wo = h, w
    wp = w + 2
    hp = h + 3                     # pad bottom by 2 so tap reads never go OOB
    cout = w_taps.shape[-1]

    xp = jnp.pad(x_nhwc, ((0, 0), (1, 2), (1, 1), (0, 0)))
    xp = xp.reshape(n, hp * wp, c)

    th = _pick_row_tile(ho, wp)
    kernel = functools.partial(_conv3x3_bn_relu_kernel, th=th, wp=wp)

    out2w = pl.pallas_call(
        kernel,
        out_shape=jax.ShapeDtypeStruct((n, ho * wp, cout), out_dtype),
        grid=(n, ho // th),
        in_specs=[
            # whole padded image of batch element n, resident across row tiles
            pl.BlockSpec((None, hp * wp, c), lambda i, t: (i, 0, 0)),
            pl.BlockSpec((9, c, cout), lambda i, t: (0, 0, 0)),
            pl.BlockSpec((1, cout), lambda i, t: (0, 0)),
            pl.BlockSpec((1, cout), lambda i, t: (0, 0)),
        ],
        out_specs=pl.BlockSpec((None, th * wp, cout), lambda i, t: (i, t, 0)),
        compiler_params=pltpu.CompilerParams(
            dimension_semantics=("parallel", "arbitrary"),
            vmem_limit_bytes=VMEM_LIMIT),
    )(xp, w_taps, scale, bias)

    # drop the 2 garbage (right-padding) columns of every row
    out2 = out2w.reshape(n, ho, wp, cout)[:, :, :wo, :]
    return out2.reshape(n * ho * wo, cout)


# ---------------------------------------------------------------------------
# Plain-JAX glue: weight/BN folding, im2col fallback
# ---------------------------------------------------------------------------
def _packed_weight_dense(w_oihw, groups):
    """Grouped conv weight (Cout, Cin//G, kh, kw) -> dense block-diagonal
    per-tap weight (kh*kw, Cin, Cout)."""
    cout, cin_g, kh, kw = w_oihw.shape
    cog = cout // groups
    cin = cin_g * groups
    wt = w_oihw.reshape(groups, cog, cin_g, kh, kw)
    wt = jnp.transpose(wt, (3, 4, 0, 2, 1))          # (kh, kw, G, cin_g, cog)
    dense = jnp.zeros((kh * kw, cin, cout), w_oihw.dtype)
    for g in range(groups):
        blk = wt[:, :, g].reshape(kh * kw, cin_g, cog)
        dense = dense.at[:, g * cin_g:(g + 1) * cin_g,
                         g * cog:(g + 1) * cog].set(blk)
    return dense


def _fold_bn(bn):
    scale = bn["weight"] / jnp.sqrt(bn["running_var"] + BN_EPS)
    bias = bn["bias"] - bn["running_mean"] * scale
    return scale.reshape(1, -1).astype(jnp.float32), bias.reshape(1, -1).astype(jnp.float32)


def _im2col_3x3(x_nhwc, stride):
    # Fallback (stride != 1): patch K-order = (kh, kw, Cin), matching _packed_weight_dense.
    n, h, w, c = x_nhwc.shape
    xp = jnp.pad(x_nhwc, ((0, 0), (1, 1), (1, 1), (0, 0)))
    ho = (h + 2 - 3) // stride + 1
    wo = (w + 2 - 3) // stride + 1
    taps = [xp[:, kh:kh + (ho - 1) * stride + 1:stride,
               kw:kw + (wo - 1) * stride + 1:stride, :]
            for kh in range(3) for kw in range(3)]
    patches = jnp.stack(taps, axis=3)                 # (N, ho, wo, 9, C)
    return patches.reshape(n * ho * wo, 9 * c), ho, wo


def _packed_groups(extended_in, gamma, groups, num_estimators, min_cpg=64):
    actual = gamma * groups * num_estimators
    while ((extended_in % actual != 0 or extended_in // actual < min_cpg)
           and actual // (groups * num_estimators) > 1):
        gamma -= 1
        actual = gamma * groups * num_estimators
    return actual


# ---------------------------------------------------------------------------
# Parameter initialization (deterministic, synthetic)
# ---------------------------------------------------------------------------
def init_bottleneck_params(key, in_planes, planes, *, alpha=2, num_estimators=4,
                           gamma=1, groups=1, stride=1):
    expansion = 4
    ext_in = in_planes * alpha
    ext_mid = planes * alpha
    ext_out = expansion * planes * alpha

    g1 = _packed_groups(ext_in, 1, groups, num_estimators)       # conv1 uses gamma=1
    g2 = _packed_groups(ext_mid, gamma, groups, num_estimators)
    g3 = _packed_groups(ext_mid, gamma, groups, num_estimators)
    gs = _packed_groups(ext_in, gamma, groups, num_estimators)

    keys = jax.random.split(key, 16)

    def conv_w(k, cout, cin_g, ksz):
        return (jax.random.normal(k, (cout, cin_g, ksz, ksz), jnp.float32)
                * (1.0 / np.sqrt(cin_g * ksz * ksz)))

    def bn_p(kw, kb, km, kv, c):
        return dict(
            weight=jax.random.uniform(kw, (c,), jnp.float32, 0.5, 1.5),
            bias=jax.random.normal(kb, (c,), jnp.float32) * 0.1,
            running_mean=jax.random.normal(km, (c,), jnp.float32) * 0.1,
            running_var=jax.random.uniform(kv, (c,), jnp.float32, 0.5, 1.5),
        )

    params = dict(
        stride=stride,
        groups=dict(conv1=g1, conv2=g2, conv3=g3, shortcut=gs),
        conv1_w=conv_w(keys[0], ext_mid, ext_in // g1, 1),
        bn1=bn_p(keys[1], keys[2], keys[3], keys[4], ext_mid),
        conv2_w=conv_w(keys[5], ext_mid, ext_mid // g2, 3),
        bn2=bn_p(keys[6], keys[7], keys[8], keys[9], ext_mid),
        conv3_w=conv_w(keys[10], ext_out, ext_mid // g3, 1),
        bn3=bn_p(keys[11], keys[12], keys[13], keys[14], ext_out),
        has_shortcut=(stride != 1 or in_planes != expansion * planes),
    )
    if params["has_shortcut"]:
        k2 = jax.random.split(keys[15], 5)
        params["shortcut_w"] = conv_w(k2[0], ext_out, ext_in // gs, 1)
        params["bn_s"] = bn_p(k2[1], k2[2], k2[3], k2[4], ext_out)
    return params


# ---------------------------------------------------------------------------
# Bottleneck forward (Pallas path)
# ---------------------------------------------------------------------------
def bottleneck_forward(params, x_nchw):
    x = jnp.transpose(x_nchw, (0, 2, 3, 1)).astype(jnp.float32)      # NCHW -> NHWC
    n, h, w, cin = x.shape
    stride = params["stride"]
    g = params["groups"]
    cmid = params["conv1_w"].shape[0]
    cout = params["conv3_w"].shape[0]

    # conv1 (1x1) + bn1 + relu : one M-tiled dense matmul (block-diag weight)
    w1 = _packed_weight_dense(params["conv1_w"], g["conv1"])[0].astype(jnp.bfloat16)
    s1, b1 = _fold_bn(params["bn1"])
    x_flat = x.reshape(n * h * w, cin).astype(jnp.bfloat16)
    out1 = matmul_bn(x_flat, w1, s1, b1, relu=True, out_dtype=jnp.bfloat16)
    out1 = out1.reshape(n, h, w, cmid)

    # conv2 (3x3, pad 1, stride) + bn2 + relu
    w2 = _packed_weight_dense(params["conv2_w"], g["conv2"]).astype(jnp.bfloat16)
    s2, b2 = _fold_bn(params["bn2"])
    if stride == 1:
        out2_flat = conv3x3_bn_relu(out1, w2, s2, b2, out_dtype=jnp.bfloat16)
        ho, wo = h, w
    else:
        # TODO(synk): strided 3x3 falls back to materialized im2col.
        patches, ho, wo = _im2col_3x3(out1, stride)
        out2_flat = matmul_bn(patches, w2.reshape(9 * cmid, cmid), s2, b2,
                              relu=True, out_dtype=jnp.bfloat16)

    # conv3 (1x1) + bn3 + shortcut + add + relu : one fused kernel
    w3 = _packed_weight_dense(params["conv3_w"], g["conv3"])[0].astype(jnp.bfloat16)
    s3, b3 = _fold_bn(params["bn3"])
    if params["has_shortcut"]:
        wsc = _packed_weight_dense(params["shortcut_w"], g["shortcut"])[0].astype(jnp.bfloat16)
        ssc, bsc = _fold_bn(params["bn_s"])
        xs = x[:, ::stride, ::stride, :].reshape(n * ho * wo, cin).astype(jnp.bfloat16)
        out_flat = matmul_bn_dual(out2_flat, w3, s3, b3, xs, wsc, ssc, bsc,
                                  out_dtype=jnp.float32)
    else:
        res = x.reshape(n * h * w, cin).astype(jnp.bfloat16)
        out_flat = matmul_bn(out2_flat, w3, s3, b3, relu=True,
                             residual=res, out_dtype=jnp.float32)

    out = out_flat.reshape(n, ho, wo, cout)
    return jnp.transpose(out, (0, 3, 1, 2))                           # NHWC -> NCHW


# ---------------------------------------------------------------------------
# Pure-JAX reference (XLA grouped conv) for correctness check
# ---------------------------------------------------------------------------
def _conv_ref(x_nhwc, w_oihw, stride, padding, groups):
    w_hwio = jnp.transpose(w_oihw, (2, 3, 1, 0))
    return jax.lax.conv_general_dilated(
        x_nhwc, w_hwio, (stride, stride),
        [(padding, padding), (padding, padding)],
        dimension_numbers=("NHWC", "HWIO", "NHWC"),
        feature_group_count=groups,
        precision=jax.lax.Precision.HIGHEST)


def _bn_ref(x, bn):
    return ((x - bn["running_mean"]) / jnp.sqrt(bn["running_var"] + BN_EPS)
            * bn["weight"] + bn["bias"])


def bottleneck_reference(params, x_nchw, match_dtype=None):
    """match_dtype=jnp.bfloat16 mirrors the kernel's matmul-input / intermediate
    precision so the comparison can be tight; None gives the pure-f32 reference."""
    rd = (lambda a: a) if match_dtype is None else \
         (lambda a: a.astype(match_dtype).astype(jnp.float32))
    x = rd(jnp.transpose(x_nchw, (0, 2, 3, 1)).astype(jnp.float32))
    stride = params["stride"]
    g = params["groups"]
    out = jax.nn.relu(_bn_ref(_conv_ref(x, rd(params["conv1_w"]), 1, 0, g["conv1"]),
                              params["bn1"]))
    out = rd(out)
    out = jax.nn.relu(_bn_ref(_conv_ref(out, rd(params["conv2_w"]), stride, 1, g["conv2"]),
                              params["bn2"]))
    out = rd(out)
    out3 = _bn_ref(_conv_ref(out, rd(params["conv3_w"]), 1, 0, g["conv3"]), params["bn3"])
    if params["has_shortcut"]:
        sc = _bn_ref(_conv_ref(x, rd(params["shortcut_w"]), stride, 0, g["shortcut"]),
                     params["bn_s"])
    else:
        sc = x
    out = jax.nn.relu(out3 + sc)
    return jnp.transpose(out, (0, 3, 1, 2))


if __name__ == "__main__":
    key = jax.random.PRNGKey(0)
    alpha, num_estimators, gamma, groups = 2, 4, 1, 1
    N, HW = 2, 8

    configs = [
        dict(in_planes=16, planes=16, stride=1),   # conv shortcut + fused 3x3 path
        dict(in_planes=16, planes=16, stride=2),   # strided: im2col fallback path
        dict(in_planes=64, planes=16, stride=1),   # identity shortcut path
    ]

    for i, cfg in enumerate(configs):
        kx, kp = jax.random.split(jax.random.fold_in(key, i))
        in_planes, planes, stride = cfg["in_planes"], cfg["planes"], cfg["stride"]

        x = jax.random.normal(kx, (N, in_planes * alpha, HW, HW), jnp.float32)
        params = init_bottleneck_params(kp, in_planes, planes, alpha=alpha,
                                        num_estimators=num_estimators, gamma=gamma,
                                        groups=groups, stride=stride)

        out = jax.block_until_ready(bottleneck_forward(params, x))
        ref_matched = jax.block_until_ready(
            bottleneck_reference(params, x, match_dtype=jnp.bfloat16))
        ref_f32 = jax.block_until_ready(bottleneck_reference(params, x))

        assert out.shape == (N, 4 * planes * alpha, HW // stride, HW // stride), out.shape
        np.testing.assert_allclose(np.asarray(out), np.asarray(ref_matched),
                                   rtol=2e-2, atol=2e-2)
        np.testing.assert_allclose(np.asarray(out), np.asarray(ref_f32),
                                   rtol=1e-1, atol=1e-1)

    print("KERNEL_OK")
</pallas_src>

<mosaic_0001>
module attributes {stable_mosaic.version = 11 : i64} {
  func.func @_mm_bn_kernel(%arg0: i32, %arg1: memref<128x32xbf16, #tpu.memory_space<vmem>>, %arg2: memref<32x32xbf16, #tpu.memory_space<vmem>>, %arg3: memref<1x32xf32, #tpu.memory_space<vmem>>, %arg4: memref<1x32xf32, #tpu.memory_space<vmem>>, %arg5: memref<128x32xbf16, #tpu.memory_space<vmem>>) attributes {dimension_semantics = [#tpu.dimension_semantics<parallel>], iteration_bounds = array<i64: 1>, scalar_prefetch = 0 : i64, scratch_operands = 0 : i64, tpu.core_type = #tpu.core_type<tc>, window_params = [{transform_indices = @transform_0, window_bounds = array<i64: 128, 32>}, {pipeline_mode = #tpu.pipeline_mode<synchronous>, transform_indices = @transform_1, window_bounds = array<i64: 32, 32>}, {pipeline_mode = #tpu.pipeline_mode<synchronous>, transform_indices = @transform_2, window_bounds = array<i64: 1, 32>}, {pipeline_mode = #tpu.pipeline_mode<synchronous>, transform_indices = @transform_3, window_bounds = array<i64: 1, 32>}, {transform_indices = @transform_4, window_bounds = array<i64: 128, 32>}]} {
    %c0 = arith.constant 0 : index
    %c0_0 = arith.constant 0 : index
    %0 = vector.load %arg1[%c0, %c0_0] : memref<128x32xbf16, #tpu.memory_space<vmem>>, vector<128x32xbf16>
    %c0_1 = arith.constant 0 : index
    %c0_2 = arith.constant 0 : index
    %1 = vector.load %arg2[%c0_1, %c0_2] : memref<32x32xbf16, #tpu.memory_space<vmem>>, vector<32x32xbf16>
    %cst = arith.constant dense<0.000000e+00> : vector<128x32xf32>
    %2 = tpu.matmul %0, %1, %cst {dimension_numbers = #tpu.dot_dimension_numbers<[1], [0], [0], [1], [0, 0, 1, 1], [], []>} : vector<128x32xbf16>, vector<32x32xbf16>, vector<128x32xf32> -> vector<128x32xf32>
    %c0_3 = arith.constant 0 : index
    %c0_4 = arith.constant 0 : index
    %3 = vector.load %arg3[%c0_3, %c0_4] : memref<1x32xf32, #tpu.memory_space<vmem>>, vector<1x32xf32>
    %4 = vector.broadcast %3 : vector<1x32xf32> to vector<128x32xf32>
    %5 = arith.mulf %2, %4 : vector<128x32xf32>
    %c0_5 = arith.constant 0 : index
    %c0_6 = arith.constant 0 : index
    %6 = vector.load %arg4[%c0_5, %c0_6] : memref<1x32xf32, #tpu.memory_space<vmem>>, vector<1x32xf32>
    %7 = vector.broadcast %6 : vector<1x32xf32> to vector<128x32xf32>
    %8 = arith.addf %5, %7 : vector<128x32xf32>
    %cst_7 = arith.constant 0.000000e+00 : f32
    %9 = vector.broadcast %cst_7 : f32 to vector<128x32xf32>
    %10 = arith.maximumf %8, %9 : vector<128x32xf32>
    %11 = arith.truncf %10 : vector<128x32xf32> to vector<128x32xbf16>
    %c0_8 = arith.constant 0 : index
    %c0_9 = arith.constant 0 : index
    %12 = vector.load %arg5[%c0_8, %c0_9] : memref<128x32xbf16, #tpu.memory_space<vmem>>, vector<128x32xbf16>
    tpu.vector_store %arg5[%c0_8, %c0_9], %11 {strides = array<i32>} : memref<128x32xbf16, #tpu.memory_space<vmem>>, vector<128x32xbf16>,
    return
  }
  func.func @transform_0(%arg0: i32) -> (i32, i32) {
    %c0_i32 = arith.constant 0 : i32
    %c0_i32_0 = arith.constant 0 : i32
    return %arg0, %c0_i32 : i32, i32
  }
  func.func @transform_1(%arg0: i32) -> (i32, i32) {
    %c0_i32 = arith.constant 0 : i32
    %c0_i32_0 = arith.constant 0 : i32
    %c0_i32_1 = arith.constant 0 : i32
    return %c0_i32, %c0_i32_0 : i32, i32
  }
  func.func @transform_2(%arg0: i32) -> (i32, i32) {
    %c0_i32 = arith.constant 0 : i32
    %c0_i32_0 = arith.constant 0 : i32
    %c0_i32_1 = arith.constant 0 : i32
    return %c0_i32, %c0_i32_0 : i32, i32
  }
  func.func @transform_3(%arg0: i32) -> (i32, i32) {
    %c0_i32 = arith.constant 0 : i32
    %c0_i32_0 = arith.constant 0 : i32
    %c0_i32_1 = arith.constant 0 : i32
    return %c0_i32, %c0_i32_0 : i32, i32
  }
  func.func @transform_4(%arg0: i32) -> (i32, i32) {
    %c0_i32 = arith.constant 0 : i32
    %c0_i32_0 = arith.constant 0 : i32
    return %arg0, %c0_i32 : i32, i32
  }
}

</mosaic_0001>

<bundles_post_ra>
// kernel: tpu_custom_call.1
= control target key start
LH: loop header
LB: loop body
LE: loop exit
PB: predicated region body
PF: predicated region fallthrough
CT: control target
= control target key end

     0   :  { %vm90_vm0 = vcmask 261120   ;;  %vm236_vm1 = vcmask 257024   ;;  %s492_s1 = inlined_call_operand.vmem [shape: bf16[32,32], index: 1, kind: input, shape index: {}]   ;;  %s493_s0 = inlined_call_operand.vmem [shape: bf16[128,32], index: 0, kind: input, shape index: {}]   ;;  %s494_s2 = inlined_call_operand.vmem [shape: f32[1,32], index: 2, kind: input, shape index: {}]   ;;  %s495_s3 = inlined_call_operand.vmem [shape: f32[1,32], index: 3, kind: input, shape index: {}]   ;;  %s496_s4 = inlined_call_operand.vmem [shape: bf16[128,32], index: 4, kind: output, shape index: {}]  }
   0x1   :  { %v314_v0 = vld [vmem:[%s492_s1 + $0x8] sm:$0xff]  ;;  %v313_v1 = vld [vmem:[%s492_s1] sm:$0xff]  ;;  %v307_v3 = vld [vmem:[%s493_s0 + $0x10] sm:$0xff] }
   0x2   :  { %121 = vmatpush.bf16.msra.mxu0 %v314_v0  ;;  %315 = vmatpush.bf16.msra.mxu1 %v314_v0  ;;  %v305_v2 = vld [vmem:[%s493_s0] sm:$0xff]  ;;  %v311_v5 = vld [vmem:[%s493_s0 + $0x30] sm:$0xff]  ;;  %v306_v6 = vld [vmem:[%s493_s0 + $0x8] sm:$0xff] }
   0x3   :  { %316 = vmatpush.bf16.msra.mxu2 %v314_v0  ;;  %317 = vmatpush.bf16.msra.mxu3 %v314_v0  ;;  %v309_v4 = vld [vmem:[%s493_s0 + $0x20] sm:$0xff]  ;;  %v308_v7 = vld [vmem:[%s493_s0 + $0x18] sm:$0xff]  ;;  %v310_v8 = vld [vmem:[%s493_s0 + $0x28] sm:$0xff] }
   0x4   :  { %v312_v9 = vld [vmem:[%s493_s0 + $0x38] sm:$0xff]  ;;  %v389_v10 = vld [vmem:[%s494_s2] ss:$0 sm:$0xff] }
   0x5   :  { %v394_v11 = vld [vmem:[%s495_s3] ss:$0 sm:$0xff] }
   0x6   :  { %122 = vmatpush.bf16.msra.mxu0 %v313_v1  ;;  %318 = vmatpush.bf16.msra.mxu1 %v313_v1 }
   0x7   :  { %319 = vmatpush.bf16.msra.mxu2 %v313_v1  ;;  %320 = vmatpush.bf16.msra.mxu3 %v313_v1 }
   0x9   :  { %297 = vmatmul.msk.bf16.vlgmr.msra.gmra.mxu0 %vm90_vm0, %v305_v2  ;;  %299 = vmatmul.msk.bf16.vlgmr.msra.gmra.mxu1 %vm90_vm0, %v307_v3 }
   0xa   :  { %301 = vmatmul.msk.bf16.vlgmr.msra.gmra.mxu2 %vm90_vm0, %v309_v4  ;;  %303 = vmatmul.msk.bf16.vlgmr.msra.gmra.mxu3 %vm90_vm0, %v311_v5 }
  0x19   :  { %298 = vmatmul.msk.bf16.gmra.mxu0 %vm90_vm0, %v306_v6  ;;  %300 = vmatmul.msk.bf16.gmra.mxu1 %vm90_vm0, %v308_v7 }
  0x1a   :  { %302 = vmatmul.msk.bf16.gmra.mxu2 %vm90_vm0, %v310_v8  ;;  %304 = vmatmul.msk.bf16.gmra.mxu3 %vm90_vm0, %v312_v9 }
  0x86   :  { %v124_v12 = vpop.f32.mrf.mxu0  ;;  %v134_v13 = vpop.f32.mrf.mxu1 }
  0x87   :  { %v168_v14 = vmul.f32 %v389_v10, %v124_v12  ;;  %v172_v15 = vmul.f32 %v389_v10, %v134_v13 }
  0x89   :  { %v188_v16 = vadd.f32 %v394_v11, %v168_v14  ;;  %v192_v17 = vadd.f32 %v394_v11, %v172_v15 }
  0x8b   :  { %v204_v18 = vmax.f32 %v188_v16, 0.0  ;;  %v208_v19 = vmax.f32 %v192_v17, 0.0 }
  0x8d   :  { %v220_v20 = vpack.c.bf16 %v204_v18, %v204_v18  ;;  %v224_v21 = vpack.c.bf16 %v208_v19, %v208_v19  ;;  %v144_v22 = vpop.f32.mrf.mxu2  ;;  %v154_v23 = vpop.f32.mrf.mxu3 }
  0x8e   :  { %v176_v24 = vmul.f32 %v389_v10, %v144_v22  ;;  %v180_v25 = vmul.f32 %v389_v10, %v154_v23  ;;  %v126_v26 = vpop.f32.mrf.mxu0  ;;  %v136_v27 = vpop.f32.mrf.mxu1 }
  0x8f   :  { %237 = vst.msk [vmem:[%s496_s4] sm:$0xf] %vm236_vm1, %v220_v20  ;;  %v169_v28 = vmul.f32 %v389_v10, %v126_v26  ;;  %v173_v29 = vmul.f32 %v389_v10, %v136_v27 }
  0x90   :  { %241 = vst.msk [vmem:[%s496_s4 + $0x10] sm:$0xf] %vm236_vm1, %v224_v21  ;;  %v196_v30 = vadd.f32 %v394_v11, %v176_v24  ;;  %v200_v31 = vadd.f32 %v394_v11, %v180_v25 }
  0x91   :  { %v189_v32 = vadd.f32 %v394_v11, %v169_v28  ;;  %v193_v33 = vadd.f32 %v394_v11, %v173_v29 }
  0x92   :  { %v212_v34 = vmax.f32 %v196_v30, 0.0  ;;  %v216_v35 = vmax.f32 %v200_v31, 0.0 }
  0x93   :  { %v205_v36 = vmax.f32 %v189_v32, 0.0  ;;  %v209_v37 = vmax.f32 %v193_v33, 0.0 }
  0x94   :  { %v228_v38 = vpack.c.bf16 %v212_v34, %v212_v34  ;;  %v232_v39 = vpack.c.bf16 %v216_v35, %v216_v35 }
  0x95   :  { %v221_v40 = vpack.c.bf16 %v205_v36, %v205_v36  ;;  %v225_v41 = vpack.c.bf16 %v209_v37, %v209_v37  ;;  %v146_v42 = vpop.f32.mrf.mxu2  ;;  %v156_v43 = vpop.f32.mrf.mxu3 }
  0x96   :  { %245 = vst.msk [vmem:[%s496_s4 + $0x20] sm:$0xf] %vm236_vm1, %v228_v38  ;;  %v177_v44 = vmul.f32 %v389_v10, %v146_v42  ;;  %v181_v45 = vmul.f32 %v389_v10, %v156_v43  ;;  %v129_v46 = vpop.f32.mrf.mxu0  ;;  %v139_v47 = vpop.f32.mrf.mxu1 }
  0x97   :  { %249 = vst.msk [vmem:[%s496_s4 + $0x30] sm:$0xf] %vm236_vm1, %v232_v39  ;;  %v170_v48 = vmul.f32 %v389_v10, %v129_v46  ;;  %v174_v49 = vmul.f32 %v389_v10, %v139_v47 }
  0x98   :  { %238 = vst.msk [vmem:[%s496_s4 + $0x4] sm:$0xf] %vm236_vm1, %v221_v40  ;;  %v197_v50 = vadd.f32 %v394_v11, %v177_v44  ;;  %v201_v51 = vadd.f32 %v394_v11, %v181_v45 }
  0x99   :  { %242 = vst.msk [vmem:[%s496_s4 + $0x14] sm:$0xf] %vm236_vm1, %v225_v41  ;;  %v190_v52 = vadd.f32 %v394_v11, %v170_v48  ;;  %v194_v53 = vadd.f32 %v394_v11, %v174_v49 }
  0x9a   :  { %v213_v54 = vmax.f32 %v197_v50, 0.0  ;;  %v217_v55 = vmax.f32 %v201_v51, 0.0 }
  0x9b   :  { %v206_v56 = vmax.f32 %v190_v52, 0.0  ;;  %v210_v57 = vmax.f32 %v194_v53, 0.0 }
  0x9c   :  { %v229_v58 = vpack.c.bf16 %v213_v54, %v213_v54  ;;  %v233_v59 = vpack.c.bf16 %v217_v55, %v217_v55 }
  0x9d   :  { %v222_v60 = vpack.c.bf16 %v206_v56, %v206_v56  ;;  %v226_v61 = vpack.c.bf16 %v210_v57, %v210_v57  ;;  %v149_v62 = vpop.f32.mrf.mxu2  ;;  %v159_v63 = vpop.f32.mrf.mxu3 }
  0x9e   :  { %246 = vst.msk [vmem:[%s496_s4 + $0x24] sm:$0xf] %vm236_vm1, %v229_v58  ;;  %v178_v0 = vmul.f32 %v389_v10, %v149_v62  ;;  %v182_v1 = vmul.f32 %v389_v10, %v159_v63  ;;  %v131_v2 = vpop.f32.mrf.mxu0  ;;  %v141_v3 = vpop.f32.mrf.mxu1 }
  0x9f   :  { %250 = vst.msk [vmem:[%s496_s4 + $0x34] sm:$0xf] %vm236_vm1, %v233_v59  ;;  %v171_v4 = vmul.f32 %v389_v10, %v131_v2  ;;  %v175_v5 = vmul.f32 %v389_v10, %v141_v3 }
  0xa0   :  { %239 = vst.msk [vmem:[%s496_s4 + $0x8] sm:$0xf] %vm236_vm1, %v222_v60  ;;  %v198_v6 = vadd.f32 %v394_v11, %v178_v0  ;;  %v202_v7 = vadd.f32 %v394_v11, %v182_v1 }
  0xa1   :  { %243 = vst.msk [vmem:[%s496_s4 + $0x18] sm:$0xf] %vm236_vm1, %v226_v61  ;;  %v191_v8 = vadd.f32 %v394_v11, %v171_v4  ;;  %v195_v9 = vadd.f32 %v394_v11, %v175_v5 }
  0xa2   :  { %v214_v12 = vmax.f32 %v198_v6, 0.0  ;;  %v218_v13 = vmax.f32 %v202_v7, 0.0 }
  0xa3   :  { %v207_v14 = vmax.f32 %v191_v8, 0.0  ;;  %v211_v15 = vmax.f32 %v195_v9, 0.0 }
  0xa4   :  { %v230_v16 = vpack.c.bf16 %v214_v12, %v214_v12  ;;  %v234_v17 = vpack.c.bf16 %v218_v13, %v218_v13 }
  0xa5   :  { %v223_v18 = vpack.c.bf16 %v207_v14, %v207_v14  ;;  %v227_v19 = vpack.c.bf16 %v211_v15, %v211_v15  ;;  %v151_v20 = vpop.f32.mrf.mxu2  ;;  %v161_v21 = vpop.f32.mrf.mxu3 }
  0xa6   :  { %247 = vst.msk [vmem:[%s496_s4 + $0x28] sm:$0xf] %vm236_vm1, %v230_v16  ;;  %v179_v22 = vmul.f32 %v389_v10, %v151_v20  ;;  %v183_v23 = vmul.f32 %v389_v10, %v161_v21 }
  0xa7   :  { %251 = vst.msk [vmem:[%s496_s4 + $0x38] sm:$0xf] %vm236_vm1, %v234_v17 }
  0xa8   :  { %240 = vst.msk [vmem:[%s496_s4 + $0xc] sm:$0xf] %vm236_vm1, %v223_v18  ;;  %v199_v24 = vadd.f32 %v394_v11, %v179_v22  ;;  %v203_v25 = vadd.f32 %v394_v11, %v183_v23 }
  0xa9   :  { %244 = vst.msk [vmem:[%s496_s4 + $0x1c] sm:$0xf] %vm236_vm1, %v227_v19 }
  0xaa   :  { %v215_v10 = vmax.f32 %v199_v24, 0.0  ;;  %v219_v26 = vmax.f32 %v203_v25, 0.0 }
  0xac   :  { %v231_v27 = vpack.c.bf16 %v215_v10, %v215_v10  ;;  %v235_v28 = vpack.c.bf16 %v219_v26, %v219_v26 }
  0xae   :  { %248 = vst.msk [vmem:[%s496_s4 + $0x2c] sm:$0xf] %vm236_vm1, %v231_v27 }
  0xaf   :  { %252 = vst.msk [vmem:[%s496_s4 + $0x3c] sm:$0xf] %vm236_vm1, %v235_v28 }

</bundles_post_ra>
